<compile_context>
chip_gen: v5e
topology: v5e:2x2
jax: 0.10.0
libtpu: 0.0.40
codegen_flags: <defaults>
</compile_context>

<pallas_src>
import functools

import jax
import jax.numpy as jnp
from jax.experimental import pallas as pl
from jax.experimental.pallas import tpu as pltpu


def gatconv_fused_kernel(x_ref, adj_ref, w_ref, out_ref, *, out_channels):
    # x_ref:   (NG, F+1)   bf16 node features, trailing constant-1 column (bias fold)
    # adj_ref: (1, NG, NG) int8, block-diagonal within the group; adj[i, j] != 0
    #                      iff edge j -> i (self loops included)
    # w_ref:   (F+1, C+2)  bf16 fused weight [W | W a_src^T | W a_dst^T ; b | 0 | 0]
    # out_ref: (NG, C)     f32
    C = out_channels
    x = x_ref[...]                                                # (NG, F+1) bf16
    w = w_ref[...]                                                # (F+1, C+2) bf16

    # One MXU matmul (bf16 operands, f32 accumulation) produces h (+bias) and
    # both attention scalars.
    h_ext = jnp.dot(x, w, preferred_element_type=jnp.float32)     # (NG, C+2) f32
    h = h_ext[:, :C]                                              # (NG, C) = xW + b
    a_src = h_ext[:, C:C + 1]                                     # (NG, 1) <xW, att_src>
    a_dst = h_ext[:, C + 1:C + 2]                                 # (NG, 1) <xW, att_dst>

    # logits[i, j] = leaky_relu(a_dst[i] + a_src[j], slope=0.2).
    # Transpose lands on the XLU slot (has slack); mul+max instead of cmp+select.
    logits = a_dst + jnp.transpose(a_src)                         # (NG, NG) f32
    logits = jnp.maximum(logits, 0.2 * logits)

    # Masked softmax over incoming edges (f32 throughout).  The -1e30 sentinel
    # makes exp underflow to exactly 0 on masked entries, so no second select.
    mask = adj_ref[0] != 0                                        # (NG, NG) bool
    masked = jnp.where(mask, logits, -1e30)
    m = jnp.max(masked, axis=-1, keepdims=True)                   # finite: self loops
    p = jnp.exp(masked - m)                                       # unnormalized weights
    denom = jnp.sum(p, axis=-1, keepdims=True)                    # (NG, 1), >= 1

    # Aggregate first (bf16 MXU operands, f32 acc), normalize after with an
    # exact divide (approx reciprocal was the source of the previous failure).
    agg = jnp.dot(p.astype(jnp.bfloat16), h.astype(jnp.bfloat16),
                  preferred_element_type=jnp.float32)             # (NG, C)
    out_ref[...] = agg / denom


def gat_conv1(x, adj, w, att_src, att_dst, bias, *, num_groups=2):
    """x: (B,N,F) f32, adj: (B,N,N) int8, w: (F,C), att_*: (1,C), bias: (1,C)."""
    B, N, F = x.shape
    C = w.shape[1]
    G = num_groups if (B % num_groups == 0) else 1   # groups == grid steps (TCs)
    GB = B // G                                      # graphs per group
    NG = GB * N                                      # rows per group

    # Fold attention projections + bias into one weight (done once, outside kernel).
    w_fused = jnp.concatenate(
        [jnp.concatenate([w, w @ att_src.T, w @ att_dst.T], axis=1),     # (F, C+2)
         jnp.concatenate([bias, jnp.zeros((1, 2), w.dtype)], axis=1)],   # (1, C+2)
        axis=0).astype(jnp.bfloat16)                                     # (F+1, C+2)

    # Flatten graphs: one big (B*N, F+1) feature slab, bf16 matmul operand.
    x_ext = jnp.concatenate([x, jnp.ones((B, N, 1), x.dtype)], axis=-1)  # (B, N, F+1)
    x_flat = x_ext.reshape(B * N, F + 1).astype(jnp.bfloat16)

    # Per-group block-diagonal adjacency (int8).  Masked softmax + self loops keep
    # attention confined within each graph, so results match per-graph processing.
    adj_g = adj.reshape(G, GB, N, N)
    adj_bd = jnp.zeros((G, NG, NG), jnp.int8)
    for k in range(GB):
        adj_bd = adj_bd.at[:, k * N:(k + 1) * N, k * N:(k + 1) * N].set(adj_g[:, k])

    kernel = functools.partial(gatconv_fused_kernel, out_channels=C)
    out_flat = pl.pallas_call(
        kernel,
        out_shape=jax.ShapeDtypeStruct((B * N, C), jnp.float32),
        grid=(G,),
        in_specs=[
            pl.BlockSpec((NG, F + 1), lambda g: (g, 0)),          # features (per group)
            pl.BlockSpec((1, NG, NG), lambda g: (g, 0, 0)),       # int8 block-diag adj
            pl.BlockSpec((F + 1, C + 2), lambda g: (0, 0)),       # shared fused weight
        ],
        # NOTE: C=2 lane-width forces masked partial stores; fine at this size.
        out_specs=pl.BlockSpec((NG, C), lambda g: (g, 0)),
        compiler_params=pltpu.CompilerParams(
            dimension_semantics=("parallel",)),  # 2-TC split on v7x, no-op on v5e/v6e
    )(x_flat, adj_bd, w_fused)
    return out_flat.reshape(B, N, C)


def dense_reference(x, adj, w, att_src, att_dst, bias):
    # Pure-JAX f32 reference of the densified GATConv math.
    h = jnp.einsum('bnf,fc->bnc', x, w)
    a_src = jnp.sum(h * att_src, axis=-1, keepdims=True)
    a_dst = jnp.sum(h * att_dst, axis=-1, keepdims=True)
    logits = a_dst + jnp.swapaxes(a_src, -1, -2)
    logits = jnp.where(logits >= 0.0, logits, 0.2 * logits)
    mask = adj != 0
    masked = jnp.where(mask, logits, -1e30)
    attn = jax.nn.softmax(masked, axis=-1)
    attn = jnp.where(mask, attn, 0.0)
    attn = attn / jnp.sum(attn, axis=-1, keepdims=True)
    return jnp.einsum('bij,bjc->bic', attn, h) + bias


if __name__ == "__main__":
    # GATConv(192, 2, heads=1); B graphs collapsed into one block-diagonal call.
    B, N, F, C = 8, 16, 192, 2

    key = jax.random.PRNGKey(0)
    kx, kw, ks, kd, kb = jax.random.split(key, 5)

    x = jax.random.normal(kx, (B, N, F), jnp.float32)

    # Deterministic bidirectional ring graph (unique edges -> dense mask softmax ==
    # PyG edge softmax) with self loops (GATConv add_self_loops=True default).
    src = jnp.concatenate([jnp.arange(N), (jnp.arange(N) + 1) % N])
    dst = jnp.concatenate([(jnp.arange(N) + 1) % N, jnp.arange(N)])
    adj1 = jnp.zeros((N, N), jnp.int8).at[dst, src].set(1)
    adj1 = adj1.at[jnp.arange(N), jnp.arange(N)].set(1)
    adj = jnp.broadcast_to(adj1, (B, N, N))            # int8: 4x smaller DMA than f32

    # Deterministic GATConv parameters (glorot-ish scaling), heads=1, no lin bias.
    w = jax.random.normal(kw, (F, C), jnp.float32) * (1.0 / jnp.sqrt(F))
    att_src = jax.random.normal(ks, (1, C), jnp.float32) * (1.0 / jnp.sqrt(C))
    att_dst = jax.random.normal(kd, (1, C), jnp.float32) * (1.0 / jnp.sqrt(C))
    bias = jax.random.normal(kb, (1, C), jnp.float32) * 0.01

    out = gat_conv1(x, adj, w, att_src, att_dst, bias)
    out = jax.block_until_ready(out)

    ref = dense_reference(x, adj, w, att_src, att_dst, bias)
    assert out.shape == (B, N, C)
    # bf16 matmul operands (f32 accumulation) bound the kernel-vs-f32-reference
    # error at roughly ~1e-2 worst case for O(1) features (K=193); 5e-2 is a safe
    # margin while still catching any structural/semantic mistake.
    assert jnp.max(jnp.abs(out - ref)) < 5e-2

    print("KERNEL_OK")
</pallas_src>

<mosaic_0001>
module attributes {stable_mosaic.version = 11 : i64} {
  func.func @gatconv_fused_kernel(%arg0: i32, %arg1: memref<64x193xbf16, #tpu.memory_space<vmem>>, %arg2: memref<1x64x64xi8, #tpu.memory_space<vmem>>, %arg3: memref<193x4xbf16, #tpu.memory_space<vmem>>, %arg4: memref<64x2xf32, #tpu.memory_space<vmem>>) attributes {dimension_semantics = [#tpu.dimension_semantics<parallel>], iteration_bounds = array<i64: 2>, scalar_prefetch = 0 : i64, scratch_operands = 0 : i64, tpu.core_type = #tpu.core_type<tc>, window_params = [{transform_indices = @transform_0, window_bounds = array<i64: 64, 193>}, {transform_indices = @transform_1, window_bounds = array<i64: 1, 64, 64>}, {pipeline_mode = #tpu.pipeline_mode<synchronous>, transform_indices = @transform_2, window_bounds = array<i64: 193, 4>}, {transform_indices = @transform_3, window_bounds = array<i64: 64, 2>}]} {
    %c0 = arith.constant 0 : index
    %c0_0 = arith.constant 0 : index
    %0 = vector.load %arg1[%c0, %c0_0] : memref<64x193xbf16, #tpu.memory_space<vmem>>, vector<64x193xbf16>
    %c0_1 = arith.constant 0 : index
    %c0_2 = arith.constant 0 : index
    %1 = vector.load %arg3[%c0_1, %c0_2] : memref<193x4xbf16, #tpu.memory_space<vmem>>, vector<193x4xbf16>
    %cst = arith.constant dense<0.000000e+00> : vector<64x4xf32>
    %2 = tpu.matmul %0, %1, %cst {dimension_numbers = #tpu.dot_dimension_numbers<[1], [0], [0], [1], [0, 0, 1, 1], [], []>} : vector<64x193xbf16>, vector<193x4xbf16>, vector<64x4xf32> -> vector<64x4xf32>
    %3 = vector.extract_strided_slice %2 {offsets = [0, 0], sizes = [64, 2], strides = [1, 1]} : vector<64x4xf32> to vector<64x2xf32>
    %4 = vector.extract_strided_slice %2 {offsets = [0, 2], sizes = [64, 1], strides = [1, 1]} : vector<64x4xf32> to vector<64x1xf32>
    %5 = vector.extract_strided_slice %2 {offsets = [0, 3], sizes = [64, 1], strides = [1, 1]} : vector<64x4xf32> to vector<64x1xf32>
    %6 = tpu.transpose %4, [1, 0] : vector<64x1xf32> -> vector<1x64xf32>
    %7 = vector.broadcast %5 : vector<64x1xf32> to vector<64x64xf32>
    %8 = vector.broadcast %6 : vector<1x64xf32> to vector<64x64xf32>
    %9 = arith.addf %7, %8 : vector<64x64xf32>
    %cst_3 = arith.constant 2.000000e-01 : f32
    %10 = vector.broadcast %cst_3 : f32 to vector<64x64xf32>
    %11 = arith.mulf %10, %9 : vector<64x64xf32>
    %12 = arith.maximumf %9, %11 : vector<64x64xf32>
    %c0_4 = arith.constant 0 : index
    %c0_5 = arith.constant 0 : index
    %c0_6 = arith.constant 0 : index
    %13 = vector.load %arg2[%c0_4, %c0_5, %c0_6] : memref<1x64x64xi8, #tpu.memory_space<vmem>>, vector<1x64x64xi8>
    %14 = vector.shape_cast %13 : vector<1x64x64xi8> to vector<64x64xi8>
    %c0_i8 = arith.constant 0 : i8
    %15 = vector.broadcast %c0_i8 : i8 to vector<64x64xi8>
    %16 = arith.cmpi ne, %14, %15 : vector<64x64xi8>
    %cst_7 = arith.constant -1.000000e+30 : f32
    %17 = vector.broadcast %cst_7 : f32 to vector<64x64xf32>
    %18 = arith.select %16, %12, %17 : vector<64x64xi1>, vector<64x64xf32>
    %cst_8 = arith.constant dense<0xFF800000> : vector<64xf32>
    %19 = vector.multi_reduction <maximumf>, %18, %cst_8 [1] : vector<64x64xf32> to vector<64xf32>
    %20 = vector.shape_cast %19 : vector<64xf32> to vector<64x1xf32>
    %21 = vector.broadcast %20 : vector<64x1xf32> to vector<64x64xf32>
    %22 = arith.subf %18, %21 : vector<64x64xf32>
    %23 = math.exp %22 : vector<64x64xf32>
    %cst_9 = arith.constant dense<0.000000e+00> : vector<64xf32>
    %24 = vector.multi_reduction <add>, %23, %cst_9 [1] : vector<64x64xf32> to vector<64xf32>
    %25 = vector.shape_cast %24 : vector<64xf32> to vector<64x1xf32>
    %26 = arith.truncf %23 : vector<64x64xf32> to vector<64x64xbf16>
    %27 = arith.truncf %3 : vector<64x2xf32> to vector<64x2xbf16>
    %cst_10 = arith.constant dense<0.000000e+00> : vector<64x2xf32>
    %28 = tpu.matmul %26, %27, %cst_10 {dimension_numbers = #tpu.dot_dimension_numbers<[1], [0], [0], [1], [0, 0, 1, 1], [], []>} : vector<64x64xbf16>, vector<64x2xbf16>, vector<64x2xf32> -> vector<64x2xf32>
    %29 = vector.broadcast %25 : vector<64x1xf32> to vector<64x2xf32>
    %30 = arith.divf %28, %29 : vector<64x2xf32>
    %c0_11 = arith.constant 0 : index
    %c0_12 = arith.constant 0 : index
    %31 = vector.load %arg4[%c0_11, %c0_12] : memref<64x2xf32, #tpu.memory_space<vmem>>, vector<64x2xf32>
    tpu.vector_store %arg4[%c0_11, %c0_12], %30 {strides = array<i32>} : memref<64x2xf32, #tpu.memory_space<vmem>>, vector<64x2xf32>,
    return
  }
  func.func @transform_0(%arg0: i32) -> (i32, i32) {
    %c0_i32 = arith.constant 0 : i32
    %c0_i32_0 = arith.constant 0 : i32
    return %arg0, %c0_i32 : i32, i32
  }
  func.func @transform_1(%arg0: i32) -> (i32, i32, i32) {
    %c0_i32 = arith.constant 0 : i32
    %c0_i32_0 = arith.constant 0 : i32
    %c0_i32_1 = arith.constant 0 : i32
    return %arg0, %c0_i32, %c0_i32_0 : i32, i32, i32
  }
  func.func @transform_2(%arg0: i32) -> (i32, i32) {
    %c0_i32 = arith.constant 0 : i32
    %c0_i32_0 = arith.constant 0 : i32
    %c0_i32_1 = arith.constant 0 : i32
    return %c0_i32, %c0_i32_0 : i32, i32
  }
  func.func @transform_3(%arg0: i32) -> (i32, i32) {
    %c0_i32 = arith.constant 0 : i32
    %c0_i32_0 = arith.constant 0 : i32
    return %arg0, %c0_i32 : i32, i32
  }
}

</mosaic_0001>

<bundles_post_ra>
// kernel: tpu_custom_call.1
= control target key start
LH: loop header
LB: loop body
LE: loop exit
PB: predicated region body
PF: predicated region fallthrough
CT: control target
= control target key end

     0   :  { %s1141_s12 = smov 0   ;;  %s1338_s0 = inlined_call_operand.vmem [shape: bf16[128,193], index: 0, kind: input, shape index: {}]   ;;  %s1339_s1 = inlined_call_operand.vmem [shape: s8[2,64,64], index: 1, kind: input, shape index: {}]   ;;  %s1340_s2 = inlined_call_operand.vmem [shape: bf16[193,4], index: 2, kind: input, shape index: {}]   ;;  %s1341_s3 = inlined_call_operand.vmem [shape: f32[128,2], index: 3, kind: output, shape index: {}]  }
   0x1 LB: > { %s1147_s13 = sadd.s32 4294967295, %s1116_s12   ;;  %p935_p0 = scmp.ge.s32.totalorder %s1116_s12, 1  ;;  %s1116_s12 = sphi %s1141_s12, %s13_s12  }
   0x2   : > { %p149_p1 = scmp.lt.s32.totalorder %s1116_s12, 3 }
   0x4   : > { %p150_p2 = pnand %p935_p0, %p149_p1 }
   0x5   : > { %s936_s20 = sshll.u32 (!%p150_p2), %s1147_s13, 3  ;;  %s1120_s21 = smov (!%p150_p2), 126  }
   0x6   : > { %153 = sbr.rel (%p150_p2) target bundleno = 878 (0x36e), region = 32  ;;  %p180_p3 = scmp.lt.s32.totalorder (!%p150_p2), %s936_s20, 15 }
   0x7   : > { %p186_p4 = scmp.lt.s32.totalorder (!%p150_p2), %s1147_s13, 1 }
   0xb   : > { %v1050_v0 = vld [vmem:[%s1340_s2 + $0x38] sm:$0xff]  ;;  %v232_v1 = vld [vmem:[%s1340_s2 + $0x60] sm:$0x1]  ;;  %vm357_vm0 = vcmask 1040384   ;;  %v1049_v3 = vld [vmem:[%s1340_s2 + $0x30] sm:$0xff]  ;;  %v1118_v4 = vmov 0  }
   0xc   : > { %v318_v2 = vunpack.c.l.b16 %v232_v1  ;;  %363 = vmatpush.bf16.msra.mxu0 %v1050_v0  ;;  %1055 = vmatpush.bf16.msra.mxu3 %v1050_v0  ;;  %v359_v5 = vsel %vm357_vm0, 65535, %v1118_v4  ;;  %v1048_v8 = vld [vmem:[%s1340_s2 + $0x28] sm:$0xff]  ;;  %v1054_v9 = vld [vmem:[%s1340_s2 + $0x58] sm:$0xff]  ;;  %s1343_s20 = smov (!%p180_p3, %s936_s20), 15  ;;  %v1047_v10 = vld [vmem:[%s1340_s2 + $0x20] sm:$0xff]  ;;  %vm344_vm1 = vcmask 531456  }
   0xd   : > { %v1053_v11 = vld [vmem:[%s1340_s2 + $0x50] sm:$0xff]  ;;  %s1033_s29 = sshll.u32 %s1343_s20, 3  ;;  %v1046_v12 = vld [vmem:[%s1340_s2 + $0x18] sm:$0xff]  ;;  %v1052_v13 = vld [vmem:[%s1340_s2 + $0x48] sm:$0xff]  ;;  %v1119_v42 = vmov 3   ;;  %s1345_s13 = smov (!%p186_p4, %s1147_s13), 1 }
   0xe   : > { %v331_v6 = vpack.c.b16 %v318_v2, %v318_v2  ;;  %s1188_s9 = scalar_lea.vmem %s1338_s0, %s1033_s29  ;;  %v1045_v14 = vld [vmem:[%s1340_s2 + $0x10] sm:$0xff]  ;;  %v1051_v15 = vld [vmem:[%s1340_s2 + $0x40] sm:$0xff]  ;;  %v1044_v19 = vld [vmem:[%s1340_s2 + $0x8] sm:$0xff]  ;;  %1075 = vset.pattern.permute.xlu2 %v1119_v42  ;;  %1077 = vset.pattern.permute.xlu1 %v1119_v42  ;;  %s1034_s22 = sshll.u32 %s1345_s13, 4  ;;  %vm612_vm10 = vcmask 523264  }
   0xf   : > { %v1035_v16 = vld [vmem:[%s1188_s9 + $0x4] sm:$0xf]  ;;  %v947_v17 = vld [vmem:[%s1188_s9 + $0x8] sm:$0xf0]  ;;  %v945_v21 = vld [vmem:[%s1188_s9] sm:$0xf]  ;;  %1076 = vset.pattern.permute.xlu0 %v1119_v42  ;;  %s190_s25 = scalar_lea.vmem %s1339_s1, %s1034_s22  ;;  %s1317_s27 = scalar_lea.vmem %s1341_s3, %s1033_s29 }
  0x10   : > { %v361_v7 = vand.u32 %v359_v5, %v331_v6  ;;  %364 = vmatpush.bf16.msra.mxu0 %v1049_v3  ;;  %1056 = vmatpush.bf16.msra.mxu3 %v1049_v3  ;;  %v950_v18 = vor.u32 %v1035_v16, %v947_v17  ;;  %v1043_v20 = vld [vmem:[%s1340_s2] sm:$0xff]  ;;  %v1036_v22 = vld [vmem:[%s1188_s9 + $0x4] sm:$0xf0]  ;;  %v953_v23 = vld [vmem:[%s1188_s9 + $0x10] sm:$0xf] }
  0x11   : > { %v1038_v24 = vld [vmem:[%s1188_s9 + $0x14] sm:$0xf0]  ;;  %v946_v25 = vor.u32 %v1036_v22, %v945_v21  ;;  %v1037_v27 = vld [vmem:[%s1188_s9 + $0x14] sm:$0xf]  ;;  %v955_v28 = vld [vmem:[%s1188_s9 + $0x18] sm:$0xf0] }
  0x12   : > { %395 = vmatpush.bf16.msra.mxu1 %v361_v7  ;;  %v954_v26 = vor.u32 %v1038_v24, %v953_v23  ;;  %v958_v29 = vor.u32 %v1037_v27, %v955_v28  ;;  %v961_v30 = vld [vmem:[%s1188_s9 + $0x20] sm:$0xf]  ;;  %v1040_v31 = vld [vmem:[%s1188_s9 + $0x24] sm:$0xf0]  ;;  %v1039_v33 = vld [vmem:[%s1188_s9 + $0x24] sm:$0xf] }
  0x13   : > { %v962_v32 = vor.u32 %v1040_v31, %v961_v30  ;;  %v963_v34 = vld [vmem:[%s1188_s9 + $0x28] sm:$0xf0]  ;;  %v969_v36 = vld [vmem:[%s1188_s9 + $0x30] sm:$0xf]  ;;  %v1042_v37 = vld [vmem:[%s1188_s9 + $0x34] sm:$0xf0] }
  0x14   : > { %365 = vmatpush.bf16.msra.mxu0 %v1048_v8  ;;  %1057 = vmatpush.bf16.msra.mxu3 %v1048_v8  ;;  %v966_v35 = vor.u32 %v1039_v33, %v963_v34  ;;  %v970_v38 = vor.u32 %v1042_v37, %v969_v36  ;;  %v1041_v39 = vld [vmem:[%s1188_s9 + $0x34] sm:$0xf]  ;;  %v971_v40 = vld [vmem:[%s1188_s9 + $0x38] sm:$0xf0]  ;;  %v543_v22 = vld [vmem:[%s190_s25 + $0x8] sm:$0xff] }
  0x15   : > { %v974_v41 = vor.u32 %v1041_v39, %v971_v40  ;;  %v542_v23 = vld [vmem:[%s190_s25] sm:$0xff]  ;;  %vm545_vm2 = vnez %v543_v22 }
  0x16   : > { %396 = vmatpush.bf16.msra.mxu1 %v1054_v9  ;;  %vm544_vm3 = vnez %v542_v23  ;;  %v1250_v24 = vsel %vm545_vm2, 16843009, %v1118_v4 }
  0x18   : > { %366 = vmatpush.bf16.msra.mxu0 %v1047_v10  ;;  %1058 = vmatpush.bf16.msra.mxu3 %v1047_v10 }
  0x1a   : > { %397 = vmatpush.bf16.msra.mxu1 %v1053_v11 }
  0x1c   : > { %367 = vmatpush.bf16.msra.mxu0 %v1046_v12  ;;  %1059 = vmatpush.bf16.msra.mxu3 %v1046_v12 }
  0x1e   : > { %398 = vmatpush.bf16.msra.mxu1 %v1052_v13 }
  0x20   : > { %368 = vmatpush.bf16.msra.mxu0 %v1045_v14  ;;  %1060 = vmatpush.bf16.msra.mxu3 %v1045_v14 }
  0x22   : > { %399 = vmatpush.bf16.msra.mxu1 %v1051_v15 }
  0x24   : > { %369 = vmatpush.bf16.msra.mxu0 %v1044_v19  ;;  %1061 = vmatpush.bf16.msra.mxu3 %v1044_v19 }
  0x25   : > { %1023 = vmatmul.msk.bf16.vlgmr.msra.gmra.mxu1 %vm344_vm1, %v950_v18 }
  0x28   : > { %370 = vmatpush.bf16.msra.mxu0 %v1043_v20  ;;  %1062 = vmatpush.bf16.msra.mxu3 %v1043_v20 }
  0x2b   : > { %371 = vmatmul.bf16.vlgmr.msra.gmra.mxu0 %v946_v25  ;;  %376 = vmatmul.bf16.vlgmr.msra.gmra.mxu3 %v954_v26  ;;  %v546_v25 = vsel %vm544_vm3, 16843009, %v1118_v4  ;;  %v552_v26 = vunpack.c.0.s8 %v1250_v24 }
  0x2c   : > { %v549_v27 = vunpack.c.1.s8 %v546_v25  ;;  %v548_v28 = vunpack.c.0.s8 %v546_v25 }
  0x2e   : > { %v558_v30 = vpack.c.b16 %v549_v27, %v549_v27  ;;  %v556_v31 = vpack.c.b16 %v548_v28, %v548_v28 }
  0x30   : > { %v559_v33 = vpack.c.b8 %v558_v30, %v558_v30  ;;  %v557_v34 = vpack.c.b8 %v556_v31, %v556_v31 }
  0x32   : > { %vm573_vm5 = vnez %v559_v33  ;;  %vm572_vm6 = vnez %v557_v34 }
  0x33   : > { %v581_v36 = vsel %vm573_vm5, 16843009, %v1118_v4  ;;  %v580_v37 = vsel %vm572_vm6, 16843009, %v1118_v4 }
  0x34   : > { %v588_v42 = vunpack.c.0.s8 %v580_v37 }
  0x35   : > { %1024 = vmatmul.msk.bf16.gmra.mxu1 %vm344_vm1, %v958_v29  ;;  %v564_v29 = vpack.c.b16 %v552_v26, %v552_v26  ;;  %v554_v26 = vunpack.c.2.s8 %v1250_v24 }
  0x36   : > { %vm596_vm9 = vcmp.ne.s32.totalorder %v588_v42, 0 }
  0x37   : > { %v568_v27 = vpack.c.b16 %v554_v26, %v554_v26 }
  0x39   : > { %v569_v28 = vpack.c.b8 %v568_v27, %v568_v27 }
  0x3b   : > { %381 = vmatmul.bf16.gmra.mxu3 %v962_v32  ;;  %v565_v32 = vpack.c.b8 %v564_v29, %v564_v29 }
  0x3d   : > { %vm576_vm4 = vnez %v565_v32  ;;  %v555_v32 = vunpack.c.3.s8 %v1250_v24 }
  0x45   : > { %1025 = vmatmul.msk.bf16.gmra.mxu1 %vm344_vm1, %v966_v35  ;;  %v584_v35 = vsel %vm576_vm4, 16843009, %v1118_v4 }
  0x46   : > { %v592_v40 = vunpack.c.0.s8 %v584_v35 }
  0x48   : > { %vm600_vm7 = vcmp.ne.s32.totalorder %v592_v40, 0 }
  0x4b   : > { %386 = vmatmul.bf16.gmra.mxu3 %v970_v38 }
  0x55   : > { %1026 = vmatmul.msk.bf16.gmra.mxu1 %vm344_vm1, %v974_v41  ;;  %v589_v41 = vunpack.c.0.s8 %v581_v36  ;;  %vm578_vm1 = vnez %v569_v28  ;;  %v570_v36 = vpack.c.b16 %v555_v32, %v555_v32 }
  0x56   : > { %v586_v37 = vsel %vm578_vm1, 16843009, %v1118_v4 }
  0x57   : > { %vm597_vm8 = vcmp.ne.s32.totalorder %v589_v41, 0  ;;  %v594_v40 = vunpack.c.0.s8 %v586_v37  ;;  %v571_v41 = vpack.c.b8 %v570_v36, %v570_v36 }
  0x59   : > { %vm602_vm2 = vcmp.ne.s32.totalorder %v594_v40, 0  ;;  %vm579_vm3 = vnez %v571_v41 }
  0xa2   : > { %v401_v43 = vpop.f32.mrf.mxu1 }
  0xa8   : > { %v372_v44 = vpop.f32.mrf.mxu0 }
  0xa9   : > { %v402_v45 = vadd.f32 %v401_v43, %v372_v44 }
  0xaa   : > { %v403_v46 = vpop.f32.mrf.mxu1 }
  0xab   : > { %486 = vperm.xlu2 %1075, %v402_v45   ;;  %429 = vrot.lane.b32.xlu0 %v402_v45, %s1120_s21 }
  0xae   : > { %v377_v47 = vpop.f32.mrf.mxu3 }
  0xb0   : > { %v374_v48 = vpop.f32.mrf.mxu0 }
  0xb1   : > { %v404_v49 = vadd.f32 %v403_v46, %v374_v48 }
  0xb2   : > { %v406_v50 = vpop.f32.mrf.mxu1 }
  0xb3   : > { %v407_v51 = vadd.f32 %v406_v50, %v377_v47  ;;  %431 = vrot.lane.b32.xlu0 %v404_v49, %s1120_s21  ;;  %v689_v7 = vpack.c.bf16 %v404_v49, %v402_v45 }
  0xb5   : > { %433 = vrot.lane.b32.xlu1 %v407_v51, %s1120_s21 }
  0xb6   : > { %v379_v52 = vpop.f32.mrf.mxu3 }
  0xba   : > { %v408_v53 = vpop.f32.mrf.mxu1 }
  0xbb   : > { %v409_v54 = vadd.f32 %v408_v53, %v379_v52  ;;  %490 = vperm.xlu0 %1076, %v404_v49  }
  0xbd   : > { %494 = vperm.xlu1 %1077, %v407_v51   ;;  %498 = vperm.xlu2 %1075, %v409_v54   ;;  %v690_v6 = vpack.c.bf16 %v409_v54, %v407_v51 }
  0xbe   : > { %v382_v55 = vpop.f32.mrf.mxu3 }
  0xc2   : > { %v411_v56 = vpop.f32.mrf.mxu1 }
  0xc3   : > { %v412_v57 = vadd.f32 %v411_v56, %v382_v55 }
  0xc5   : > { %435 = vrot.lane.b32.xlu1 %v409_v54, %s1120_s21  ;;  %437 = vrot.lane.b32.xlu2 %v412_v57, %s1120_s21 }
  0xc6   : > { %v384_v58 = vpop.f32.mrf.mxu3 }
  0xca   : > { %v413_v59 = vpop.f32.mrf.mxu1 }
  0xcb   : > { %v414_v60 = vadd.f32 %v413_v59, %v384_v58  ;;  %v551_v58 = vunpack.c.3.s8 %v546_v25 }
  0xcd   : > { %502 = vperm.xlu2 %1075, %v412_v57   ;;  %506 = vperm.xlu0 %1076, %v414_v60   ;;  %v691_v5 = vpack.c.bf16 %v414_v60, %v412_v57  ;;  %v562_v59 = vpack.c.b16 %v551_v58, %v551_v58 }
  0xce   : > { %v387_v61 = vpop.f32.mrf.mxu3 }
  0xd2   : > { %v416_v62 = vpop.f32.mrf.mxu1 }
  0xd3   : > { %v1227_v63 = vadd.f32 %v416_v62, %v387_v61  ;;  %v563_v61 = vpack.c.b8 %v562_v59, %v562_v59 }
  0xd5   : > { %439 = vrot.lane.b32.xlu2 %v414_v60, %s1120_s21  ;;  %441 = vrot.lane.b32.xlu0 %v1227_v63, %s1120_s21  ;;  %v550_v60 = vunpack.c.2.s8 %v546_v25  ;;  %vm575_vm11 = vnez %v563_v61 }
  0xd6   : > { %v389_v0 = vpop.f32.mrf.mxu3 }
  0xd7   : > { %v560_v62 = vpack.c.b16 %v550_v60, %v550_v60 }
  0xda   : > { %v418_v1 = vpop.f32.mrf.mxu1 }
  0xdb   : > { %v1232_v2 = vadd.f32 %v418_v1, %v389_v0  ;;  %v561_v0 = vpack.c.b8 %v560_v62, %v560_v62  ;;  %v553_v1 = vunpack.c.1.s8 %v1250_v24 }
  0xdd   : > { %443 = vrot.lane.b32.xlu1 %v1232_v2, %s1120_s21  ;;  %v692_v3 = vpack.c.bf16 %v1232_v2, %v1227_v63  ;;  %vm574_vm12 = vnez %v561_v0 }
  0xdf   : > { %709 = vmatpush.bf16.msra.mxu2 %v692_v3 }
  0xe3   : > { %710 = vmatpush.bf16.msra.mxu2 %v691_v5  ;;  %v583_v5 = vsel %vm575_vm11, 16843009, %v1118_v4 }
  0xe7   : > { %711 = vmatpush.bf16.msra.mxu2 %v690_v6  ;;  %v566_v6 = vpack.c.b16 %v553_v1, %v553_v1 }
  0xeb   : > { %712 = vmatpush.bf16.msra.mxu2 %v689_v7 }
 0x105   : > { %v487_v9 = vpop.permute.xlu2 %486 }
 0x117   : > { %v1238_v12 = vpop.permute.xlu2 %498 }
 0x11d   : > { %v430_v8 = vpop.permute.xlu0 %429 }
 0x11e   : > { %453 = vxpose.xlu1.b32.start [1/8] (short) (narrow) %v430_v8, 8  ;;  %v582_v8 = vsel %vm574_vm12, 16843009, %v1118_v4 }
 0x11f   : > { %v438_v14 = vpop.permute.xlu2 %437 }
 0x125   : > { %v432_v10 = vpop.permute.xlu0 %431 }
 0x126   : > { %454 = vxpose.xlu1.b32.cont [2/8] (short) (narrow) %v432_v10, 8 }
 0x127   : > { %v434_v11 = vpop.permute.xlu1 %433  ;;  %v503_v16 = vpop.permute.xlu2 %502 }
 0x12d   : > { %v491_v17 = vpop.permute.xlu0 %490 }
 0x12e   : > { %455 = vxpose.xlu1.b32.cont [3/8] (short) (narrow) %v434_v11, 8 }
 0x12f   : > { %v1240_v13 = vpop.permute.xlu1 %494  ;;  %v440_v19 = vpop.permute.xlu2 %439 }
 0x137   : > { %v436_v15 = vpop.permute.xlu1 %435 }
 0x138   : > { %456 = vxpose.xlu1.b32.cont [4/8] (short) (narrow) %v436_v15, 8 }
 0x13f   : > { %v1242_v18 = vpop.permute.xlu0 %506 }
 0x140   : > { %457 = vxpose.xlu1.b32.cont [5/8] (short) (narrow) %v438_v14, 8  ;;  %v590_v14 = vunpack.c.0.s8 %v582_v8 }
 0x142   : > { %vm598_vm15 = vcmp.ne.s32.totalorder %v590_v14, 0 }
 0x147   : > { %v442_v20 = vpop.permute.xlu0 %441 }
 0x148   : > { %458 = vxpose.xlu1.b32.cont [6/8] (short) (narrow) %v440_v19, 8 }
 0x14f   : > { %v444_v21 = vpop.permute.xlu1 %443 }
 0x150   : > { %459 = vxpose.xlu1.b32.cont [7/8] (short) (narrow) %v442_v20, 8 }
 0x158   : > { %460 = vxpose.xlu1.b32.end [8/8] (short) (narrow) %v444_v21, 8 }
 0x1c4   : > { %v469_v38 = vpop.trf.xlu1 }
 0x1c5   : > { %v1257_v39 = vperm.slane %v469_v38, 0 }
 0x1c7   : > { %v522_v43 = vadd.f32 %v1257_v39, %v503_v16  ;;  %v519_v44 = vadd.f32 %v1257_v39, %v491_v17  ;;  %v518_v45 = vadd.f32 %v1257_v39, %v487_v9  ;;  %v521_v3 = vadd.f32 %v1257_v39, %v1238_v12 }
 0x1c8   : > { %v567_v9 = vpack.c.b8 %v566_v6, %v566_v6  ;;  %v523_v16 = vadd.f32 %v1257_v39, %v1242_v18 }
 0x1c9   : > { %v530_v46 = vmul.f32 0.2, %v522_v43  ;;  %v527_v47 = vmul.f32 0.2, %v519_v44  ;;  %v526_v48 = vmul.f32 0.2, %v518_v45 }
 0x1ca   : > { %v529_v7 = vmul.f32 0.2, %v521_v3  ;;  %vm577_vm14 = vnez %v567_v9  ;;  %v531_v20 = vmul.f32 0.2, %v523_v16 }
 0x1cb   : > { %v538_v49 = vmax.f32 %v522_v43, %v530_v46  ;;  %v535_v50 = vmax.f32 %v519_v44, %v527_v47  ;;  %v534_v51 = vmax.f32 %v518_v45, %v526_v48  ;;  %v585_v17 = vsel %vm577_vm14, 16843009, %v1118_v4 }
 0x1cc   : > { %v537_v10 = vmax.f32 %v521_v3, %v529_v7  ;;  %v593_v21 = vunpack.c.0.s8 %v585_v17  ;;  %v539_v23 = vmax.f32 %v523_v16, %v531_v20  ;;  %v587_v48 = vsel %vm579_vm3, 16843009, %v1118_v4 }
 0x1cd   : > { %v1262_v52 = vsel %vm600_vm7, %v538_v49, -1e+30  ;;  %v605_v53 = vsel %vm597_vm8, %v535_v50, -1e+30  ;;  %v604_v54 = vsel %vm596_vm9, %v534_v51, -1e+30  ;;  %v595_v51 = vunpack.c.0.s8 %v587_v48 }
 0x1ce   : > { %v625_v55 = vsel %vm612_vm10, %v1262_v52, -inf  ;;  %v616_v56 = vsel %vm612_vm10, %v605_v53, -inf  ;;  %v613_v57 = vsel %vm612_vm10, %v604_v54, -inf  ;;  %vm601_vm0 = vcmp.ne.s32.totalorder %v593_v21, 0 }
 0x1cf   : > { %626 = vmax.xlane.f32.xlu1 %v625_v55  ;;  %617 = vmax.xlane.f32.xlu0 %v616_v56  ;;  %v1285_v25 = vsel %vm601_vm0, %v539_v23, -1e+30  ;;  %vm603_vm4 = vcmp.ne.s32.totalorder %v595_v51, 0  ;;  %vm854_vm9 = vcmask 15360  }
 0x1d0   : > { %614 = vmax.xlane.f32.xlu2 %v613_v57  ;;  %v628_v18 = vsel %vm612_vm10, %v1285_v25, -inf }
 0x1e3   : > { %514 = vperm.xlu0 %1076, %v1232_v2   ;;  %v591_v2 = vunpack.c.0.s8 %v583_v5 }
 0x1e5   : > { %vm599_vm13 = vcmp.ne.s32.totalorder %v591_v2, 0 }
 0x1e6   : > { %v1277_v15 = vsel %vm599_vm13, %v537_v10, -1e+30 }
 0x1e8   : > { %510 = vperm.xlu2 %1075, %v1227_v63   ;;  %v520_v63 = vadd.f32 %v1257_v39, %v1240_v13  ;;  %v622_v13 = vsel %vm612_vm10, %v1277_v15, -inf }
 0x1ea   : > { %v528_v11 = vmul.f32 0.2, %v520_v63 }
 0x1ec   : > { %v536_v12 = vmax.f32 %v520_v63, %v528_v11 }
 0x1ee   : > { %v606_v19 = vsel %vm598_vm15, %v536_v12, -1e+30 }
 0x1ef   : > { %v619_v22 = vsel %vm612_vm10, %v606_v19, -inf }
 0x20d   : > { %623 = vmax.xlane.f32.xlu0 %v622_v13 }
 0x211   : > { %620 = vmax.xlane.f32.xlu2 %v619_v22 }
 0x219   : > { %629 = vmax.xlane.f32.xlu2 %v628_v18 }
 0x242   : > { %v618_v29 = vpop.xlane.xlu0 %617  ;;  %v627_v62 = vpop.xlane.xlu1 %626 }
 0x243   : > { %v638_v30 = vsub.f32 %v605_v53, %v618_v29  ;;  %v615_v31 = vpop.xlane.xlu2 %614  ;;  %v641_v1 = vsub.f32 %v1262_v52, %v627_v62 }
 0x244   : > { %v637_v33 = vsub.f32 %v604_v54, %v615_v31 }
 0x245   : > { %v647_v34 = vmul.f32 1.442695, %v638_v30  ;;  %v653_v6 = vmul.f32 1.442695, %v641_v1 }
 0x246   : > { %v645_v35 = vmul.f32 1.442695, %v637_v33 }
 0x247   : > { %1078 = vpow2.f32 %v647_v34 }
 0x248   : > { %1080 = vpow2.f32 %v645_v35 }
 0x24b   : > { %v511_v38 = vpop.permute.xlu2 %510 }
 0x24c   : > { %v524_v42 = vadd.f32 %v1257_v39, %v511_v38 }
 0x24d   : > { %v1079_v43 = vpop.eup %1078 }
 0x24e   : > { %v532_v44 = vmul.f32 0.2, %v524_v42  ;;  %v1081_v45 = vpop.eup %1080  ;;  %v664_v59 = vsel %vm612_vm10, %v1079_v43, 0.0 }
 0x24f   : > { %v685_v46 = vpack.c.bf16 %v1079_v43, %v1081_v45  ;;  %v661_v56 = vsel %vm612_vm10, %v1081_v45, 0.0 }
 0x250   : > { %v540_v24 = vmax.f32 %v524_v42, %v532_v44 }
 0x251   : > { %1027 = vmatmul.msk.bf16.vlgmr.msra.gmra.mxu2 %vm612_vm10, %v685_v46 }
 0x252   : > { %v610_v47 = vsel %vm602_vm2, %v540_v24, -1e+30 }
 0x253   : > { %v631_v49 = vsel %vm612_vm10, %v610_v47, -inf }
 0x254   : > { %632 = vmax.xlane.f32.xlu0 %v631_v49 }
 0x255   : > { %v515_v50 = vpop.permute.xlu0 %514 }
 0x256   : > { %v525_v53 = vadd.f32 %v1257_v39, %v515_v50 }
 0x258   : > { %v533_v54 = vmul.f32 0.2, %v525_v53 }
 0x25a   : > { %v541_v55 = vmax.f32 %v525_v53, %v533_v54 }
 0x25c   : > { %662 = vadd.xlane.f32.xlu0 %v661_v56  ;;  %v611_v57 = vsel %vm603_vm4, %v541_v55, -1e+30 }
 0x25d   : > { %v634_v58 = vsel %vm612_vm10, %v611_v57, -inf }
 0x25e   : > { %635 = vmax.xlane.f32.xlu2 %v634_v58 }
 0x266   : > { %665 = vadd.xlane.f32.xlu2 %v664_v59 }
 0x280   : > { %v624_v4 = vpop.xlane.xlu0 %623 }
 0x281   : > { %v640_v60 = vsub.f32 %v1277_v15, %v624_v4 }
 0x283   : > { %v651_v61 = vmul.f32 1.442695, %v640_v60 }
 0x284   : > { %v621_v0 = vpop.xlane.xlu2 %620 }
 0x285   : > { %1082 = vpow2.f32 %v651_v61  ;;  %v639_v39 = vsub.f32 %v606_v19, %v621_v0 }
 0x287   : > { %v649_v3 = vmul.f32 1.442695, %v639_v39 }
 0x289   : > { %1084 = vpow2.f32 %v649_v3 }
 0x28a   : > { %1086 = vpow2.f32 %v653_v6 }
 0x28b   : > { %v1083_v5 = vpop.eup %1082 }
 0x28c   : > { %v630_v7 = vpop.xlane.xlu2 %629  ;;  %v670_v63 = vsel %vm612_vm10, %v1083_v5, 0.0 }
 0x28d   : > { %v642_v2 = vsub.f32 %v1285_v25, %v630_v7  ;;  %671 = vadd.xlane.f32.xlu2 %v670_v63 }
 0x28f   : > { %v1085_v8 = vpop.eup %1084  ;;  %v655_v9 = vmul.f32 1.442695, %v642_v2 }
 0x290   : > { %v667_v10 = vsel %vm612_vm10, %v1085_v8, 0.0  ;;  %v686_v11 = vpack.c.bf16 %v1083_v5, %v1085_v8  ;;  %v1087_v52 = vpop.eup %1086 }
 0x291   : > { %1088 = vpow2.f32 %v655_v9  ;;  %668 = vadd.xlane.f32.xlu0 %v667_v10  ;;  %v673_v15 = vsel %vm612_vm10, %v1087_v52, 0.0 }
 0x292   : > { %1028 = vmatmul.msk.bf16.gmra.mxu2 %vm612_vm10, %v686_v11 }
 0x297   : > { %v1089_v14 = vpop.eup %1088 }
 0x298   : > { %v676_v12 = vsel %vm612_vm10, %v1089_v14, 0.0  ;;  %v687_v16 = vpack.c.bf16 %v1089_v14, %v1087_v52 }
 0x299   : > { %674 = vadd.xlane.f32.xlu0 %v673_v15  ;;  %677 = vadd.xlane.f32.xlu2 %v676_v12 }
 0x2a2   : > { %1029 = vmatmul.msk.bf16.gmra.mxu2 %vm612_vm10, %v687_v16 }
 0x2c7   : > { %v633_v17 = vpop.xlane.xlu0 %632 }
 0x2c8   : > { %v643_v13 = vsub.f32 %v610_v47, %v633_v17 }
 0x2ca   : > { %v657_v19 = vmul.f32 1.442695, %v643_v13 }
 0x2cc   : > { %1090 = vpow2.f32 %v657_v19 }
 0x2cf   : > { %v663_v20 = vpop.xlane.xlu0 %662 }
 0x2d0   : > { %1092 = vrcp.f32 %v663_v20  ;;  %v745_v30 = vand.u32 2147483648, %v663_v20  ;;  %v743_v32 = vand.u32 2147483647, %v663_v20  ;;  %vm739_vm6 = vweird.f32 %v663_v20 }
 0x2d1   : > { %v636_v21 = vpop.xlane.xlu2 %635 }
 0x2d2   : > { %v1091_v22 = vpop.eup %1090  ;;  %v644_v23 = vsub.f32 %v611_v57, %v636_v21  ;;  %v746_v37 = vor.u32 1.1754944e-38, %v745_v30  ;;  %vm744_vm8 = vcmp.eq.f32.partialorder %v743_v32, 8.507059e+37 }
 0x2d3   : > { %v679_v25 = vsel %vm612_vm10, %v1091_v22, 0.0 }
 0x2d4   : > { %v659_v18 = vmul.f32 1.442695, %v644_v23  ;;  %680 = vadd.xlane.f32.xlu0 %v679_v25  ;;  %v714_v41 = vpop.f32.mrf.mxu2 }
 0x2d6   : > { %v1093_v26 = vpop.eup %1092  ;;  %1094 = vpow2.f32 %v659_v18 }
 0x2d7   : > { %v735_v27 = vmul.f32 %v1093_v26, %v663_v20  ;;  %vm740_vm5 = vweird.f32 %v1093_v26 }
 0x2d8   : > { %vm741_vm7 = vmor %vm739_vm6, %vm740_vm5 }
 0x2d9   : > { %v736_v28 = vsub.f32 1.0, %v735_v27  ;;  %v666_v29 = vpop.xlane.xlu2 %665 }
 0x2da   : > { %1096 = vrcp.f32 %v666_v29  ;;  %v760_v24 = vand.u32 2147483648, %v666_v29  ;;  %v758_v47 = vand.u32 2147483647, %v666_v29  ;;  %vm754_vm11 = vweird.f32 %v666_v29 }
 0x2db   : > { %v737_v31 = vmul.f32 %v1093_v26, %v736_v28 }
 0x2dc   : > { %v1095_v33 = vpop.eup %1094  ;;  %v761_v49 = vor.u32 1.1754944e-38, %v760_v24  ;;  %vm759_vm13 = vcmp.eq.f32.partialorder %v758_v47, 8.507059e+37  ;;  %v716_v51 = vpop.f32.mrf.mxu2 }
 0x2dd   : > { %v738_v34 = vadd.f32 %v1093_v26, %v737_v31  ;;  %v682_v35 = vsel %vm612_vm10, %v1095_v33, 0.0  ;;  %v688_v36 = vpack.c.bf16 %v1095_v33, %v1091_v22 }
 0x2de   : > { %683 = vadd.xlane.f32.xlu2 %v682_v35 }
 0x2df   : > { %v742_v38 = vsel %vm741_vm7, %v1093_v26, %v738_v34  ;;  %1030 = vmatmul.msk.bf16.gmra.mxu2 %vm612_vm10, %v688_v36 }
 0x2e0   : > { %v1097_v40 = vpop.eup %1096  ;;  %v747_v42 = vsel %vm744_vm8, %v746_v37, %v742_v38 }
 0x2e1   : > { %v748_v43 = vmul.f32 %v747_v42, %v714_v41  ;;  %v750_v44 = vmul.f32 %v1097_v40, %v666_v29  ;;  %vm755_vm10 = vweird.f32 %v1097_v40 }
 0x2e2   : > { %vm756_vm12 = vmor %vm754_vm11, %vm755_vm10 }
 0x2e3   : > { %855 = vst.msk [vmem:[%s1317_s27] sm:$0xff] %vm854_vm9, %v748_v43  ;;  %v751_v45 = vsub.f32 1.0, %v750_v44 }
 0x2e5   : > { %v752_v46 = vmul.f32 %v1097_v40, %v751_v45 }
 0x2e7   : > { %v753_v48 = vadd.f32 %v1097_v40, %v752_v46 }
 0x2e9   : > { %v757_v50 = vsel %vm756_vm12, %v1097_v40, %v753_v48 }
 0x2ea   : > { %v762_v53 = vsel %vm759_vm13, %v761_v49, %v757_v50 }
 0x2eb   : > { %v763_v54 = vmul.f32 %v762_v53, %v716_v51 }
 0x2ed   : > { %856 = vst.msk [vmem:[%s1317_s27 + $0x8] sm:$0xff] %vm854_vm9, %v763_v54 }
 0x300   : > { %v672_v55 = vpop.xlane.xlu2 %671 }
 0x301   : > { %1098 = vrcp.f32 %v672_v55  ;;  %v790_v12 = vand.u32 2147483648, %v672_v55  ;;  %vm784_vm3 = vweird.f32 %v672_v55  ;;  %v788_v16 = vand.u32 2147483647, %v672_v55 }
 0x303   : > { %v791_v20 = vor.u32 1.1754944e-38, %v790_v12  ;;  %vm789_vm5 = vcmp.eq.f32.partialorder %v788_v16, 8.507059e+37 }
 0x304   : > { %v669_v56 = vpop.xlane.xlu0 %668 }
 0x305   : > { %1100 = vrcp.f32 %v669_v56  ;;  %v775_v39 = vand.u32 2147483648, %v669_v56  ;;  %v773_v3 = vand.u32 2147483647, %v669_v56  ;;  %vm769_vm15 = vweird.f32 %v669_v56 }
 0x307   : > { %v1099_v57 = vpop.eup %1098  ;;  %v776_v63 = vor.u32 1.1754944e-38, %v775_v39  ;;  %vm774_vm1 = vcmp.eq.f32.partialorder %v773_v3, 8.507059e+37 }
 0x308   : > { %v780_v58 = vmul.f32 %v1099_v57, %v672_v55  ;;  %vm785_vm2 = vweird.f32 %v1099_v57 }
 0x309   : > { %vm786_vm4 = vmor %vm784_vm3, %vm785_vm2 }
 0x30a   : > { %v781_v61 = vsub.f32 1.0, %v780_v58 }
 0x30b   : > { %v1101_v59 = vpop.eup %1100 }
 0x30c   : > { %v765_v4 = vmul.f32 %v1101_v59, %v669_v56  ;;  %v675_v60 = vpop.xlane.xlu0 %674  ;;  %v678_v0 = vpop.xlane.xlu2 %677  ;;  %vm770_vm14 = vweird.f32 %v1101_v59  ;;  %v782_v6 = vmul.f32 %v1099_v57, %v781_v61 }
 0x30d   : > { %1102 = vrcp.f32 %v675_v60  ;;  %vm771_vm0 = vmor %vm769_vm15, %vm770_vm14  ;;  %v805_v26 = vand.u32 2147483648, %v675_v60  ;;  %vm799_vm7 = vweird.f32 %v675_v60  ;;  %v803_v27 = vand.u32 2147483647, %v675_v60 }
 0x30e   : > { %v766_v62 = vsub.f32 1.0, %v765_v4  ;;  %1104 = vrcp.f32 %v678_v0  ;;  %v783_v14 = vadd.f32 %v1099_v57, %v782_v6  ;;  %v820_v35 = vand.u32 2147483648, %v678_v0 }
 0x30f   : > { %v806_v30 = vor.u32 1.1754944e-38, %v805_v26  ;;  %vm804_vm10 = vcmp.eq.f32.partialorder %v803_v27, 8.507059e+37  ;;  %vm814_vm12 = vweird.f32 %v678_v0  ;;  %v818_v36 = vand.u32 2147483647, %v678_v0 }
 0x310   : > { %v767_v1 = vmul.f32 %v1101_v59, %v766_v62  ;;  %v787_v13 = vsel %vm786_vm4, %v1099_v57, %v783_v14  ;;  %v821_v38 = vor.u32 1.1754944e-38, %v820_v35 }
 0x311   : > { %v792_v22 = vsel %vm789_vm5, %v791_v20, %v787_v13  ;;  %vm819_vm14 = vcmp.eq.f32.partialorder %v818_v36, 8.507059e+37 }
 0x312   : > { %v768_v5 = vadd.f32 %v1101_v59, %v767_v1 }
 0x313   : > { %v1103_v7 = vpop.eup %1102 }
 0x314   : > { %v795_v2 = vmul.f32 %v1103_v7, %v675_v60  ;;  %v772_v8 = vsel %vm771_vm0, %v1101_v59, %v768_v5  ;;  %v1105_v15 = vpop.eup %1104  ;;  %vm800_vm6 = vweird.f32 %v1103_v7 }
 0x315   : > { %v719_v9 = vpop.f32.mrf.mxu2  ;;  %v777_v10 = vsel %vm774_vm1, %v776_v63, %v772_v8  ;;  %v810_v17 = vmul.f32 %v1105_v15, %v678_v0  ;;  %vm801_vm8 = vmor %vm799_vm7, %vm800_vm6  ;;  %vm815_vm11 = vweird.f32 %v1105_v15 }
 0x316   : > { %v796_v11 = vsub.f32 1.0, %v795_v2  ;;  %v778_v52 = vmul.f32 %v777_v10, %v719_v9  ;;  %vm816_vm13 = vmor %vm814_vm12, %vm815_vm11 }
 0x317   : > { %v811_v23 = vsub.f32 1.0, %v810_v17 }
 0x318   : > { %857 = vst.msk [vmem:[%s1317_s27 + $0x10] sm:$0xff] %vm854_vm9, %v778_v52  ;;  %v797_v19 = vmul.f32 %v1103_v7, %v796_v11 }
 0x319   : > { %v812_v29 = vmul.f32 %v1105_v15, %v811_v23 }
 0x31a   : > { %v798_v18 = vadd.f32 %v1103_v7, %v797_v19 }
 0x31b   : > { %v813_v34 = vadd.f32 %v1105_v15, %v812_v29 }
 0x31c   : > { %v802_v28 = vsel %vm801_vm8, %v1103_v7, %v798_v18 }
 0x31d   : > { %v721_v21 = vpop.f32.mrf.mxu2  ;;  %v807_v32 = vsel %vm804_vm10, %v806_v30, %v802_v28  ;;  %v817_v37 = vsel %vm816_vm13, %v1105_v15, %v813_v34 }
 0x31e   : > { %v793_v25 = vmul.f32 %v792_v22, %v721_v21  ;;  %v822_v41 = vsel %vm819_vm14, %v821_v38, %v817_v37 }
 0x320   : > { %858 = vst.msk [vmem:[%s1317_s27 + $0x18] sm:$0xff] %vm854_vm9, %v793_v25 }
 0x325   : > { %v724_v31 = vpop.f32.mrf.mxu2 }
 0x326   : > { %v808_v33 = vmul.f32 %v807_v32, %v724_v31 }
 0x328   : > { %859 = vst.msk [vmem:[%s1317_s27 + $0x20] sm:$0xff] %vm854_vm9, %v808_v33 }
 0x32d   : > { %v726_v40 = vpop.f32.mrf.mxu2 }
 0x32e   : > { %v823_v42 = vmul.f32 %v822_v41, %v726_v40 }
 0x330   : > { %860 = vst.msk [vmem:[%s1317_s27 + $0x28] sm:$0xff] %vm854_vm9, %v823_v42 }
 0x347   : > { %v681_v43 = vpop.xlane.xlu0 %680 }
 0x348   : > { %1106 = vrcp.f32 %v681_v43  ;;  %v835_v53 = vand.u32 2147483648, %v681_v43  ;;  %vm829_vm0 = vweird.f32 %v681_v43  ;;  %v833_v54 = vand.u32 2147483647, %v681_v43 }
 0x34a   : > { %v836_v57 = vor.u32 1.1754944e-38, %v835_v53  ;;  %vm834_vm2 = vcmp.eq.f32.partialorder %v833_v54, 8.507059e+37 }
 0x34e   : > { %v1107_v44 = vpop.eup %1106 }
 0x34f   : > { %v825_v45 = vmul.f32 %v1107_v44, %v681_v43  ;;  %vm830_vm15 = vweird.f32 %v1107_v44 }
 0x350   : > { %vm831_vm1 = vmor %vm829_vm0, %vm830_vm15 }
 0x351   : > { %v684_v24 = vpop.xlane.xlu2 %683  ;;  %v826_v46 = vsub.f32 1.0, %v825_v45 }
 0x352   : > { %1108 = vrcp.f32 %v684_v24  ;;  %v850_v61 = vand.u32 2147483648, %v684_v24  ;;  %vm844_vm4 = vweird.f32 %v684_v24  ;;  %v848_v62 = vand.u32 2147483647, %v684_v24 }
 0x353   : > { %v827_v47 = vmul.f32 %v1107_v44, %v826_v46 }
 0x354   : > { %v851_v39 = vor.u32 1.1754944e-38, %v850_v61  ;;  %vm849_vm6 = vcmp.eq.f32.partialorder %v848_v62, 8.507059e+37 }
 0x355   : > { %v828_v51 = vadd.f32 %v1107_v44, %v827_v47 }
 0x357   : > { %v832_v56 = vsel %vm831_vm1, %v1107_v44, %v828_v51 }
 0x358   : > { %v1109_v48 = vpop.eup %1108  ;;  %v837_v59 = vsel %vm834_vm2, %v836_v57, %v832_v56 }
 0x359   : > { %v840_v49 = vmul.f32 %v1109_v48, %v684_v24  ;;  %vm845_vm3 = vweird.f32 %v1109_v48 }
 0x35a   : > { %vm846_vm5 = vmor %vm844_vm4, %vm845_vm3 }
 0x35b   : > { %v841_v50 = vsub.f32 1.0, %v840_v49 }
 0x35d   : > { %v842_v55 = vmul.f32 %v1109_v48, %v841_v50 }
 0x35f   : > { %v843_v60 = vadd.f32 %v1109_v48, %v842_v55 }
 0x361   : > { %v847_v0 = vsel %vm846_vm5, %v1109_v48, %v843_v60 }
 0x362   : > { %v729_v58 = vpop.f32.mrf.mxu2  ;;  %v852_v3 = vsel %vm849_vm6, %v851_v39, %v847_v0 }
 0x363   : > { %v838_v4 = vmul.f32 %v837_v59, %v729_v58 }
 0x365   : > { %861 = vst.msk [vmem:[%s1317_s27 + $0x30] sm:$0xff] %vm854_vm9, %v838_v4 }
 0x36a   : > { %v731_v1 = vpop.f32.mrf.mxu2 }
 0x36b   : > { %v853_v5 = vmul.f32 %v852_v3, %v731_v1 }
 0x36d   : > { %862 = vst.msk [vmem:[%s1317_s27 + $0x38] sm:$0xff] %vm854_vm9, %v853_v5 }
 0x36e PF: > { %s13_s12 = sadd.s32 1, %s1116_s12  }
 0x36f   : > { %p10_p5 = scmp.ge.s32.totalorder %s13_s12, 4  }
 0x371   :  { %12 = sbr.rel (!%p10_p5) target bundleno = 1 (0x1), region = 65 }

</bundles_post_ra>
